<compile_context>
chip_gen: v5e
topology: v5e:2x2
jax: 0.10.0
libtpu: 0.0.40
codegen_flags: <defaults>
</compile_context>

<pallas_src>
import jax
import jax.numpy as jnp
from jax.experimental import pallas as pl
from jax.experimental.pallas import tpu as pltpu


def gcn_kernel(a_ref, dinv_ref, x_ref, w1_ref, b1_ref, w2t_ref, b2_ref, o_ref):
    a = a_ref[...]                  # (N, N) bf16, A + I (exact 0/1 entries)
    dinv = dinv_ref[...]            # (N, 1) f32, D^{-1/2}

    # ---- Layer 1: GCNConv(1, 16) + ReLU -------------------------------------
    # rank-1 feature lift on the VPU (no MXU pass for K=1)
    xw1 = x_ref[...] * w1_ref[...]                          # (N,1)*(1,16) -> (N,16)
    s1 = (dinv * xw1).astype(jnp.bfloat16)                  # fold right D^{-1/2}
    t1 = jnp.dot(a, s1, preferred_element_type=jnp.float32) # (N,16) MXU, f32 acc
    h = jnp.maximum(dinv * t1 + b1_ref[...], 0.0)           # left D^{-1/2}, bias, ReLU (f32 VPU)

    # ---- Layer 2: GCNConv(16, 1) --------------------------------------------
    s2 = (dinv * h).astype(jnp.bfloat16)                    # (N,16)
    t2 = jnp.dot(a, s2, preferred_element_type=jnp.float32) # (N,16) MXU, 16-lane output
    # width-1 projection on VPU + XLU lane reduce instead of a masked MXU pass
    proj = jnp.sum(t2 * w2t_ref[...], axis=-1, keepdims=True)   # (N,1)
    o_ref[...] = (dinv * proj + b2_ref[...]).astype(o_ref.dtype)


def gcn_forward(a_plus_i_bf16, dinv_sqrt, x, w1, b1, w2_t, b2):
    n = x.shape[0]
    hidden = w1.shape[1]
    vmem = pl.BlockSpec(memory_space=pltpu.MemorySpace.VMEM)
    # two (N,N)@(N,16) MXU products dominate
    flops = 2 * 2 * n * n * hidden
    bytes_accessed = (
        a_plus_i_bf16.size * 2
        + (dinv_sqrt.size + x.size + w1.size + b1.size + w2_t.size + b2.size + n) * 4
    )
    return pl.pallas_call(
        gcn_kernel,
        out_shape=jax.ShapeDtypeStruct((n, 1), jnp.float32),
        in_specs=[vmem] * 7,
        out_specs=vmem,
        cost_estimate=pl.CostEstimate(
            flops=flops, transcendentals=0, bytes_accessed=bytes_accessed
        ),
    )(a_plus_i_bf16, dinv_sqrt, x, w1, b1, w2_t, b2)


def build_adjacency_inputs(edge_index, num_nodes):
    """Raw (A + I) plus D^{-1/2}; normalization itself is applied in-kernel."""
    src = edge_index[0]
    dst = edge_index[1]
    a = jnp.zeros((num_nodes, num_nodes), jnp.float32)
    # message flows src -> dst; use .add so repeated/weighted edges sum like PyG
    a = a.at[dst, src].add(1.0)
    a = a + jnp.eye(num_nodes, dtype=jnp.float32)           # self loops
    deg = a.sum(axis=1)
    dinv_sqrt = jnp.where(deg > 0.0, 1.0 / jnp.sqrt(deg), 0.0)
    return a, dinv_sqrt.reshape(num_nodes, 1)


def glorot(key, shape):
    fan_in, fan_out = shape
    limit = jnp.sqrt(6.0 / (fan_in + fan_out))
    return jax.random.uniform(key, shape, jnp.float32, -limit, limit)


if __name__ == "__main__":
    # --- deterministic synthetic graph: ring of N nodes + a few chords -------
    N = 32
    edges = []
    for i in range(N):
        edges.append((i, (i + 1) % N))
    edges += [(0, N // 2), (3, 17), (5, 25), (8, 20)]
    # make undirected (both directions), like a networkx graph converted in PyG
    full_edges = edges + [(b, a) for (a, b) in edges]
    edge_index = jnp.array(full_edges, dtype=jnp.int32).T          # (2, E)

    # node features: x = [[1], [1], ...]  -> shape (N, 1)
    x = jnp.ones((N, 1), dtype=jnp.float32)

    # --- deterministic parameter init (GCNConv: glorot weights, zero bias) ---
    key = jax.random.PRNGKey(0)
    k1, k2 = jax.random.split(key)
    w1 = glorot(k1, (1, 16))                       # conv1 weight  (in=1,  out=16)
    b1 = jnp.zeros((1, 16), dtype=jnp.float32)     # conv1 bias
    w2 = glorot(k2, (16, 1))                       # conv2 weight  (in=16, out=1)
    b2 = jnp.zeros((1, 1), dtype=jnp.float32)      # conv2 bias

    # --- raw (A + I) and D^{-1/2} (normalization folded into the kernel) ------
    a_plus_i, dinv_sqrt = build_adjacency_inputs(edge_index, N)
    a_plus_i_bf16 = a_plus_i.astype(jnp.bfloat16)   # 0/1 entries: lossless

    # --- run Pallas kernel -----------------------------------------------------
    out = gcn_forward(a_plus_i_bf16, dinv_sqrt, x, w1, b1, w2.T, b2)
    out = jax.block_until_ready(out)

    # --- reference check in plain JAX (f32 throughout) -------------------------
    a_hat = dinv_sqrt * a_plus_i * dinv_sqrt.T
    h_ref = jnp.maximum(a_hat @ (x @ w1) + b1, 0.0)
    out_ref = a_hat @ (h_ref @ w2) + b2
    assert out.shape == (N, 1)
    # bf16 MXU operands vs f32 reference -> tolerate ~bf16 rounding
    assert jnp.allclose(out, out_ref, atol=2e-2, rtol=2e-2), "mismatch vs reference"

    print("KERNEL_OK")
</pallas_src>

<mosaic_0001>
module attributes {stable_mosaic.version = 11 : i64} {
  func.func @gcn_kernel(%arg0: memref<32x32xbf16, #tpu.memory_space<vmem>>, %arg1: memref<32x1xf32, #tpu.memory_space<vmem>>, %arg2: memref<32x1xf32, #tpu.memory_space<vmem>>, %arg3: memref<1x16xf32, #tpu.memory_space<vmem>>, %arg4: memref<1x16xf32, #tpu.memory_space<vmem>>, %arg5: memref<1x16xf32, #tpu.memory_space<vmem>>, %arg6: memref<1x1xf32, #tpu.memory_space<vmem>>, %arg7: memref<32x1xf32, #tpu.memory_space<vmem>>) attributes {dimension_semantics = [], scalar_prefetch = 0 : i64, scratch_operands = 0 : i64, tpu.core_type = #tpu.core_type<tc>} {
    %c0 = arith.constant 0 : index
    %c0_0 = arith.constant 0 : index
    %0 = vector.load %arg0[%c0, %c0_0] : memref<32x32xbf16, #tpu.memory_space<vmem>>, vector<32x32xbf16>
    %c0_1 = arith.constant 0 : index
    %c0_2 = arith.constant 0 : index
    %1 = vector.load %arg1[%c0_1, %c0_2] : memref<32x1xf32, #tpu.memory_space<vmem>>, vector<32x1xf32>
    %c0_3 = arith.constant 0 : index
    %c0_4 = arith.constant 0 : index
    %2 = vector.load %arg2[%c0_3, %c0_4] : memref<32x1xf32, #tpu.memory_space<vmem>>, vector<32x1xf32>
    %c0_5 = arith.constant 0 : index
    %c0_6 = arith.constant 0 : index
    %3 = vector.load %arg3[%c0_5, %c0_6] : memref<1x16xf32, #tpu.memory_space<vmem>>, vector<1x16xf32>
    %4 = vector.broadcast %2 : vector<32x1xf32> to vector<32x16xf32>
    %5 = vector.broadcast %3 : vector<1x16xf32> to vector<32x16xf32>
    %6 = arith.mulf %4, %5 : vector<32x16xf32>
    %7 = vector.broadcast %1 : vector<32x1xf32> to vector<32x16xf32>
    %8 = arith.mulf %7, %6 : vector<32x16xf32>
    %9 = arith.truncf %8 : vector<32x16xf32> to vector<32x16xbf16>
    %cst = arith.constant dense<0.000000e+00> : vector<32x16xf32>
    %10 = tpu.matmul %0, %9, %cst {dimension_numbers = #tpu.dot_dimension_numbers<[1], [0], [0], [1], [0, 0, 1, 1], [], []>} : vector<32x32xbf16>, vector<32x16xbf16>, vector<32x16xf32> -> vector<32x16xf32>
    %11 = vector.broadcast %1 : vector<32x1xf32> to vector<32x16xf32>
    %12 = arith.mulf %11, %10 : vector<32x16xf32>
    %c0_7 = arith.constant 0 : index
    %c0_8 = arith.constant 0 : index
    %13 = vector.load %arg4[%c0_7, %c0_8] : memref<1x16xf32, #tpu.memory_space<vmem>>, vector<1x16xf32>
    %14 = vector.broadcast %13 : vector<1x16xf32> to vector<32x16xf32>
    %15 = arith.addf %12, %14 : vector<32x16xf32>
    %cst_9 = arith.constant 0.000000e+00 : f32
    %16 = vector.broadcast %cst_9 : f32 to vector<32x16xf32>
    %17 = arith.maximumf %15, %16 : vector<32x16xf32>
    %18 = vector.broadcast %1 : vector<32x1xf32> to vector<32x16xf32>
    %19 = arith.mulf %18, %17 : vector<32x16xf32>
    %20 = arith.truncf %19 : vector<32x16xf32> to vector<32x16xbf16>
    %cst_10 = arith.constant dense<0.000000e+00> : vector<32x16xf32>
    %21 = tpu.matmul %0, %20, %cst_10 {dimension_numbers = #tpu.dot_dimension_numbers<[1], [0], [0], [1], [0, 0, 1, 1], [], []>} : vector<32x32xbf16>, vector<32x16xbf16>, vector<32x16xf32> -> vector<32x16xf32>
    %c0_11 = arith.constant 0 : index
    %c0_12 = arith.constant 0 : index
    %22 = vector.load %arg5[%c0_11, %c0_12] : memref<1x16xf32, #tpu.memory_space<vmem>>, vector<1x16xf32>
    %23 = vector.broadcast %22 : vector<1x16xf32> to vector<32x16xf32>
    %24 = arith.mulf %21, %23 : vector<32x16xf32>
    %cst_13 = arith.constant dense<0.000000e+00> : vector<32xf32>
    %25 = vector.multi_reduction <add>, %24, %cst_13 [1] : vector<32x16xf32> to vector<32xf32>
    %26 = vector.shape_cast %25 : vector<32xf32> to vector<32x1xf32>
    %27 = arith.mulf %1, %26 : vector<32x1xf32>
    %c0_14 = arith.constant 0 : index
    %c0_15 = arith.constant 0 : index
    %28 = vector.load %arg6[%c0_14, %c0_15] : memref<1x1xf32, #tpu.memory_space<vmem>>, vector<1x1xf32>
    %29 = vector.broadcast %28 : vector<1x1xf32> to vector<32x1xf32>
    %30 = arith.addf %27, %29 : vector<32x1xf32>
    %c0_16 = arith.constant 0 : index
    %c0_17 = arith.constant 0 : index
    %31 = vector.load %arg7[%c0_16, %c0_17] : memref<32x1xf32, #tpu.memory_space<vmem>>, vector<32x1xf32>
    tpu.vector_store %arg7[%c0_16, %c0_17], %30 {strides = array<i32>} : memref<32x1xf32, #tpu.memory_space<vmem>>, vector<32x1xf32>,
    return
  }
}

</mosaic_0001>

<bundles_post_ra>
// kernel: tpu_custom_call.1
= control target key start
LH: loop header
LB: loop body
LE: loop exit
PB: predicated region body
PF: predicated region fallthrough
CT: control target
= control target key end

     0   :  { %v240_v0 = vmov 0   ;;  %vm105_vm0 = vcmask 261120   ;;  %vm180_vm1 = vcmask 130048   ;;  %vm205_vm2 = vcmask 7168   ;;  %s355_s2 = inlined_call_operand.vmem [shape: f32[32,1], index: 2, kind: input, shape index: {}]   ;;  %s356_s1 = inlined_call_operand.vmem [shape: f32[32,1], index: 1, kind: input, shape index: {}]   ;;  %s357_s3 = inlined_call_operand.vmem [shape: f32[1,16], index: 3, kind: input, shape index: {}]   ;;  %s358_s4 = inlined_call_operand.vmem [shape: f32[1,16], index: 4, kind: input, shape index: {}]   ;;  %s359_s0 = inlined_call_operand.vmem [shape: bf16[32,32], index: 0, kind: input, shape index: {}]   ;;  %s360_s5 = inlined_call_operand.vmem [shape: f32[1,16], index: 5, kind: input, shape index: {}]   ;;  %s361_s6 = inlined_call_operand.<no memory space> [shape: f32[1,1], index: 6, kind: input, shape index: {}]   ;;  %s362_s7 = inlined_call_operand.vmem [shape: f32[32,1], index: 7, kind: output, shape index: {}]  }
   0x1   :  { %234 = vset.pattern.permute.xlu1 %v240_v0  ;;  %233 = vset.pattern.permute.xlu0 %v240_v0  ;;  %v39_v1 = vld [vmem:[%s355_s2 + $0x10] sm:$0xff]  ;;  %v37_v3 = vld [vmem:[%s355_s2] sm:$0xff]  ;;  %v40_v4 = vld [vmem:[%s355_s2 + $0x18] sm:$0xff]  ;;  %v12_v53 = vstv %s361_s6 }
   0x2   :  { %v287_v2 = vld [vmem:[%s356_s1 + $0x10] sm:$0xff]  ;;  %54 = vperm.xlu0 %233, %v39_v1   ;;  %235 = vset.pattern.permute.xlu2 %v240_v0  ;;  %v299_v5 = vld [vmem:[%s356_s1 + $0x18] sm:$0xff]  ;;  %v38_v6 = vld [vmem:[%s355_s2 + $0x8] sm:$0xff]  ;;  %13 = vst [vmem:[#allocation2] sm:$0x1] %v12_v53 }
   0x3   :  { %81 = vperm.xlu1 %234, %v287_v2   ;;  %44 = vperm.xlu2 %235, %v37_v3   ;;  %v308_v7 = vld [vmem:[%s356_s1 + $0x8] sm:$0xff]  ;;  %v313_v8 = vld [vmem:[%s356_s1] sm:$0xff] }
   0x4   :  { %v236_v12 = vld [vmem:[%s357_s3] ss:$0 sm:$0xff]  ;;  %v227_v29 = vld [vmem:[%s359_s0 + $0x8] sm:$0xff] }
   0x5   :  { %v226_v28 = vld [vmem:[%s359_s0] sm:$0xff] }
   0x6   :  { %v237_v34 = vld [vmem:[%s358_s4] ss:$0 sm:$0xff] }
   0x7   :  { %v238_v54 = vld [vmem:[%s360_s5] ss:$0 sm:$0xff] }
   0xa   :  { %59 = vperm.xlu0 %233, %v40_v4   ;;  %v239_v4 = vld [vmem:[#allocation2] ss:$0 sm:$0xff] }
   0xb   :  { %86 = vperm.xlu1 %234, %v299_v5   ;;  %49 = vperm.xlu2 %235, %v38_v6  }
  0x12   :  { %71 = vperm.xlu0 %233, %v313_v8  }
  0x13   :  { %76 = vperm.xlu1 %234, %v308_v7  }
  0x5d   :  { %v45_v11 = vpop.permute.xlu2 %44 }
  0x5e   :  { %v65_v21 = vmul.f32 %v236_v12, %v45_v11 }
  0x65   :  { %v50_v19 = vpop.permute.xlu2 %49 }
  0x66   :  { %v66_v22 = vmul.f32 %v236_v12, %v50_v19 }
  0x74   :  { %v55_v9 = vpop.permute.xlu0 %54 }
  0x75   :  { %v82_v10 = vpop.permute.xlu1 %81  ;;  %v67_v13 = vmul.f32 %v236_v12, %v55_v9 }
  0x77   :  { %v91_v17 = vmul.f32 %v82_v10, %v67_v13 }
  0x7c   :  { %v60_v14 = vpop.permute.xlu0 %59 }
  0x7d   :  { %v87_v15 = vpop.permute.xlu1 %86  ;;  %v68_v16 = vmul.f32 %v236_v12, %v60_v14 }
  0x7f   :  { %v92_v18 = vmul.f32 %v87_v15, %v68_v16 }
  0x81   :  { %v94_v20 = vpack.c.bf16 %v92_v18, %v91_v17 }
  0x83   :  { %118 = vmatpush.bf16.msra.mxu0 %v94_v20  ;;  %228 = vmatpush.bf16.msra.mxu2 %v94_v20 }
  0x84   :  { %v72_v24 = vpop.permute.xlu0 %71 }
  0x85   :  { %v77_v23 = vpop.permute.xlu1 %76  ;;  %v89_v25 = vmul.f32 %v72_v24, %v65_v21 }
  0x86   :  { %v90_v26 = vmul.f32 %v77_v23, %v66_v22 }
  0x88   :  { %v93_v27 = vpack.c.bf16 %v90_v26, %v89_v25 }
  0x8a   :  { %119 = vmatpush.bf16.msra.mxu0 %v93_v27  ;;  %229 = vmatpush.bf16.msra.mxu2 %v93_v27 }
  0x8d   :  { %222 = vmatmul.msk.bf16.vlgmr.msra.gmra.mxu0 %vm105_vm0, %v226_v28  ;;  %223 = vmatmul.msk.bf16.vlgmr.msra.gmra.mxu2 %vm105_vm0, %v227_v29 }
 0x10a   :  { %v121_v30 = vpop.f32.mrf.mxu0 }
 0x10b   :  { %v131_v36 = vmul.f32 %v121_v30, %v72_v24 }
 0x10d   :  { %v139_v41 = vadd.f32 %v237_v34, %v131_v36 }
 0x10f   :  { %v143_v46 = vmax.f32 %v139_v41, 0.0 }
 0x110   :  { %v126_v31 = vpop.f32.mrf.mxu2 }
 0x111   :  { %v133_v33 = vmul.f32 %v126_v31, %v82_v10  ;;  %v147_v51 = vmul.f32 %v143_v46, %v72_v24 }
 0x112   :  { %v123_v32 = vpop.f32.mrf.mxu0 }
 0x113   :  { %v132_v35 = vmul.f32 %v123_v32, %v77_v23  ;;  %v141_v37 = vadd.f32 %v237_v34, %v133_v33 }
 0x115   :  { %v140_v39 = vadd.f32 %v237_v34, %v132_v35  ;;  %v145_v42 = vmax.f32 %v141_v37, 0.0 }
 0x117   :  { %v144_v44 = vmax.f32 %v140_v39, 0.0  ;;  %v149_v47 = vmul.f32 %v145_v42, %v82_v10 }
 0x118   :  { %v128_v38 = vpop.f32.mrf.mxu2 }
 0x119   :  { %v134_v40 = vmul.f32 %v128_v38, %v87_v15  ;;  %v148_v50 = vmul.f32 %v144_v44, %v77_v23 }
 0x11b   :  { %v142_v43 = vadd.f32 %v237_v34, %v134_v40  ;;  %v151_v52 = vpack.c.bf16 %v148_v50, %v147_v51 }
 0x11d   :  { %v146_v45 = vmax.f32 %v142_v43, 0.0 }
 0x11f   :  { %v150_v48 = vmul.f32 %v146_v45, %v87_v15 }
 0x121   :  { %v152_v49 = vpack.c.bf16 %v150_v48, %v149_v47 }
 0x123   :  { %159 = vmatpush.bf16.msra.mxu1 %v152_v49  ;;  %230 = vmatpush.bf16.msra.mxu3 %v152_v49 }
 0x127   :  { %160 = vmatpush.bf16.msra.mxu1 %v151_v52  ;;  %231 = vmatpush.bf16.msra.mxu3 %v151_v52 }
 0x12a   :  { %224 = vmatmul.msk.bf16.vlgmr.msra.gmra.mxu1 %vm105_vm0, %v226_v28  ;;  %225 = vmatmul.msk.bf16.vlgmr.msra.gmra.mxu3 %vm105_vm0, %v227_v29 }
 0x1a7   :  { %v162_v55 = vpop.f32.mrf.mxu1 }
 0x1a8   :  { %v176_v56 = vmul.f32 %v238_v54, %v162_v55 }
 0x1aa   :  { %v181_v57 = vsel %vm180_vm1, %v176_v56, 0.0 }
 0x1ab   :  { %182 = vadd.xlane.f32.xlu2 %v181_v57 }
 0x1ad   :  { %v167_v58 = vpop.f32.mrf.mxu3 }
 0x1ae   :  { %v178_v59 = vmul.f32 %v238_v54, %v167_v58 }
 0x1af   :  { %v164_v60 = vpop.f32.mrf.mxu1 }
 0x1b0   :  { %v177_v61 = vmul.f32 %v238_v54, %v164_v60  ;;  %v187_v62 = vsel %vm180_vm1, %v178_v59, 0.0 }
 0x1b1   :  { %188 = vadd.xlane.f32.xlu1 %v187_v62 }
 0x1b2   :  { %v184_v63 = vsel %vm180_vm1, %v177_v61, 0.0 }
 0x1b3   :  { %185 = vadd.xlane.f32.xlu0 %v184_v63 }
 0x1b5   :  { %v169_v0 = vpop.f32.mrf.mxu3 }
 0x1b6   :  { %v179_v1 = vmul.f32 %v238_v54, %v169_v0 }
 0x1b8   :  { %v190_v3 = vsel %vm180_vm1, %v179_v1, 0.0 }
 0x1b9   :  { %191 = vadd.xlane.f32.xlu2 %v190_v3 }
 0x21e   :  { %v183_v6 = vpop.xlane.xlu2 %182 }
 0x21f   :  { %v193_v9 = vmul.f32 %v183_v6, %v313_v8 }
 0x221   :  { %v201_v10 = vadd.f32 %v239_v4, %v193_v9 }
 0x223   :  { %206 = vst.msk [vmem:[%s362_s7] sm:$0xff] %vm205_vm2, %v201_v10 }
 0x224   :  { %v189_v11 = vpop.xlane.xlu1 %188 }
 0x225   :  { %v195_v12 = vmul.f32 %v189_v11, %v287_v2 }
 0x226   :  { %v186_v13 = vpop.xlane.xlu0 %185 }
 0x227   :  { %v203_v14 = vadd.f32 %v239_v4, %v195_v12  ;;  %v194_v15 = vmul.f32 %v186_v13, %v308_v7 }
 0x229   :  { %208 = vst.msk [vmem:[%s362_s7 + $0x10] sm:$0xff] %vm205_vm2, %v203_v14  ;;  %v202_v16 = vadd.f32 %v239_v4, %v194_v15 }
 0x22b   :  { %207 = vst.msk [vmem:[%s362_s7 + $0x8] sm:$0xff] %vm205_vm2, %v202_v16 }
 0x22c   :  { %v192_v8 = vpop.xlane.xlu2 %191 }
 0x22d   :  { %v196_v17 = vmul.f32 %v192_v8, %v299_v5 }
 0x22f   :  { %v204_v18 = vadd.f32 %v239_v4, %v196_v17 }
 0x231   :  { %209 = vst.msk [vmem:[%s362_s7 + $0x18] sm:$0xff] %vm205_vm2, %v204_v18 }

</bundles_post_ra>
